<compile_context>
chip_gen: v5e
topology: v5e:2x2
jax: 0.10.0
libtpu: 0.0.40
codegen_flags: <defaults>
</compile_context>

<pallas_src>
import functools

import jax
import jax.numpy as jnp
from jax.experimental import pallas as pl
from jax.experimental.pallas import tpu as pltpu


def _normalized_mlp_kernel(n_layers, norm_ref, x_ref, *refs):
    # refs = (w0, b0, w1, b1, ..., w_{L-1}, b_{L-1}, out)
    out_ref = refs[-1]
    wb_refs = refs[:-1]

    nrm = norm_ref[...]                      # (in_dim, 2) f32, resident in VMEM
    mean = nrm[:, 0:1]                       # (in_dim, 1)
    inv_std = nrm[:, 1:2]                    # (in_dim, 1) == 1 / (std + (std == 0))

    # normalize_input, batch on lanes: h is (in_dim, TB)
    h = (x_ref[...] - mean) * inv_std

    for layer in range(n_layers):
        w = wb_refs[2 * layer][...]          # (fan_out, fan_in), f32 or bf16
        b = wb_refs[2 * layer + 1][...]      # (fan_out, 1), f32
        # MXU matmul: W @ h, f32 accumulation regardless of operand dtype.
        h = jnp.dot(w, h.astype(w.dtype), preferred_element_type=jnp.float32) + b
        if layer < n_layers - 1:
            h = jnp.maximum(h, 0.0)          # hidden_activation = ReLU
        # output_activation = None -> no activation on the last layer

    out_ref[...] = h.astype(out_ref.dtype)   # (out_dim, TB), lane-dense store


def normalized_mlp_forward(x, input_mean, input_std, weights, biases, *,
                           block_batch=512, mxu_dtype=jnp.float32):
    """weights[l]: PyTorch layout (fan_out_l, fan_in_l); biases[l]: (fan_out_l,)."""
    if x.ndim == 1:
        x = x[None, :]
    x = x.astype(jnp.float32)
    batch, in_dim = x.shape
    n_layers = len(weights)
    out_dim = weights[-1].shape[0]

    assert block_batch % 128 == 0, "batch tile must be a multiple of the lane width"
    # Batch tile: multiple of 128, as large as block_batch allows.
    tb = min(block_batch, pl.cdiv(batch, 128) * 128)
    padded_b = pl.cdiv(batch, tb) * tb
    grid = (padded_b // tb,)

    # Pad batch to a multiple of TB and put batch on the lane (last) axis.
    x_t = jnp.pad(x, ((0, padded_b - batch), (0, 0))).T          # (in_dim, padded_B)

    # normalize_input constants folded into one resident (in_dim, 2) operand:
    #   col 0 = mean, col 1 = 1 / (std + (std == 0))   (zero-std dims divide by 1)
    std = input_std.astype(jnp.float32)
    inv_std = 1.0 / (std + (std == 0.0).astype(jnp.float32))
    norm_params = jnp.stack([input_mean.astype(jnp.float32), inv_std], axis=1)

    operands = [norm_params, x_t]
    in_specs = [
        pl.BlockSpec((in_dim, 2), lambda i: (0, 0)),             # resident
        pl.BlockSpec((in_dim, tb), lambda i: (0, i)),            # pipelined per tile
    ]
    for w, b in zip(weights, biases):
        operands.append(w.astype(mxu_dtype))                     # cast once, outside kernel
        operands.append(b.reshape(-1, 1).astype(jnp.float32))
        in_specs.append(pl.BlockSpec(w.shape, lambda i: (0, 0)))         # resident
        in_specs.append(pl.BlockSpec((w.shape[0], 1), lambda i: (0, 0))) # resident

    flops = 2 * padded_b * sum(int(w.shape[0]) * int(w.shape[1]) for w in weights)
    bytes_accessed = (
        int(x_t.size) * 4 + padded_b * out_dim * 4 + int(norm_params.size) * 4
        + sum(int(w.size) for w in weights) * jnp.dtype(mxu_dtype).itemsize
        + sum(int(b.size) for b in biases) * 4
    )

    out_t = pl.pallas_call(
        functools.partial(_normalized_mlp_kernel, n_layers),
        out_shape=jax.ShapeDtypeStruct((out_dim, padded_b), jnp.float32),
        grid=grid,
        in_specs=in_specs,
        out_specs=pl.BlockSpec((out_dim, tb), lambda i: (0, i)),
        compiler_params=pltpu.CompilerParams(
            dimension_semantics=("parallel",)),                  # megacore-shards batch on v7x
        cost_estimate=pl.CostEstimate(
            flops=flops, transcendentals=0, bytes_accessed=bytes_accessed),
    )(*operands)

    # Back to (B, out_dim); drop padded rows.
    return out_t.T[:batch]


def _reference_forward(x, input_mean, input_std, weights, biases):
    if x.ndim == 1:
        x = x[None, :]
    zero_mask = (input_std == 0.0).astype(x.dtype)
    h = (x - input_mean[None, :]) / (input_std[None, :] + zero_mask[None, :])
    for l, (w, b) in enumerate(zip(weights, biases)):
        h = h @ w.T + b[None, :]                                 # PyTorch (fan_out, fan_in)
        if l < len(weights) - 1:
            h = jnp.maximum(h, 0.0)
    return h


if __name__ == "__main__":
    # Module config (synthetic, deterministic init; gain-scaled like init_param,
    # exact init scheme does not affect forward semantics).
    in_dim, out_dim = 16, 8
    hidden_layers = (32, 32)
    batch = 200          # deliberately NOT a multiple of the 128-row batch tile
    gain = 1.0

    key = jax.random.PRNGKey(0)
    keys = jax.random.split(key, 2 * (len(hidden_layers) + 1) + 3)

    dims = (in_dim,) + hidden_layers + (out_dim,)
    weights, biases = [], []
    for l in range(len(dims) - 1):
        fan_in, fan_out = dims[l], dims[l + 1]
        # PyTorch nn.Linear weight layout: (fan_out, fan_in)
        w = gain * jax.random.normal(keys[2 * l], (fan_out, fan_in), jnp.float32) / jnp.sqrt(fan_in)
        b = 0.01 * jax.random.normal(keys[2 * l + 1], (fan_out,), jnp.float32)
        weights.append(w)
        biases.append(b)

    input_mean = jax.random.normal(keys[-3], (in_dim,), jnp.float32)
    input_std = jnp.abs(jax.random.normal(keys[-2], (in_dim,), jnp.float32)) + 0.5
    # Make one dimension have zero std to exercise the zero_mask path.
    input_std = input_std.at[3].set(0.0)

    x = jax.random.normal(keys[-1], (batch, in_dim), jnp.float32)

    ref = _reference_forward(x, input_mean, input_std, weights, biases)

    # f32 path (exact check); block_batch=128 -> 2 grid steps, exercises padding + pipeline.
    out = normalized_mlp_forward(x, input_mean, input_std, weights, biases,
                                 block_batch=128)
    out = jax.block_until_ready(out)
    assert out.shape == (batch, out_dim)
    assert jnp.allclose(out, ref, atol=1e-5, rtol=1e-5), "f32 kernel mismatch vs JAX reference"

    # bf16-on-MXU path (v6e/v7x recommendation); f32 accumulation keeps it close.
    out_bf16 = normalized_mlp_forward(x, input_mean, input_std, weights, biases,
                                      block_batch=128, mxu_dtype=jnp.bfloat16)
    out_bf16 = jax.block_until_ready(out_bf16)
    assert jnp.allclose(out_bf16, ref, atol=1e-1, rtol=1e-1), "bf16 kernel mismatch vs JAX reference"

    print("KERNEL_OK")
</pallas_src>

<mosaic_0001>
module attributes {stable_mosaic.version = 11 : i64} {
  func.func @_normalized_mlp_kernel(%arg0: i32, %arg1: memref<16x2xf32, #tpu.memory_space<vmem>>, %arg2: memref<16x128xf32, #tpu.memory_space<vmem>>, %arg3: memref<32x16xf32, #tpu.memory_space<vmem>>, %arg4: memref<32x1xf32, #tpu.memory_space<vmem>>, %arg5: memref<32x32xf32, #tpu.memory_space<vmem>>, %arg6: memref<32x1xf32, #tpu.memory_space<vmem>>, %arg7: memref<8x32xf32, #tpu.memory_space<vmem>>, %arg8: memref<8x1xf32, #tpu.memory_space<vmem>>, %arg9: memref<8x128xf32, #tpu.memory_space<vmem>>) attributes {dimension_semantics = [#tpu.dimension_semantics<parallel>], iteration_bounds = array<i64: 2>, scalar_prefetch = 0 : i64, scratch_operands = 0 : i64, tpu.core_type = #tpu.core_type<tc>, window_params = [{pipeline_mode = #tpu.pipeline_mode<synchronous>, transform_indices = @transform_0, window_bounds = array<i64: 16, 2>}, {transform_indices = @transform_1, window_bounds = array<i64: 16, 128>}, {pipeline_mode = #tpu.pipeline_mode<synchronous>, transform_indices = @transform_2, window_bounds = array<i64: 32, 16>}, {pipeline_mode = #tpu.pipeline_mode<synchronous>, transform_indices = @transform_3, window_bounds = array<i64: 32, 1>}, {pipeline_mode = #tpu.pipeline_mode<synchronous>, transform_indices = @transform_4, window_bounds = array<i64: 32, 32>}, {pipeline_mode = #tpu.pipeline_mode<synchronous>, transform_indices = @transform_5, window_bounds = array<i64: 32, 1>}, {pipeline_mode = #tpu.pipeline_mode<synchronous>, transform_indices = @transform_6, window_bounds = array<i64: 8, 32>}, {pipeline_mode = #tpu.pipeline_mode<synchronous>, transform_indices = @transform_7, window_bounds = array<i64: 8, 1>}, {transform_indices = @transform_8, window_bounds = array<i64: 8, 128>}]} {
    %c0 = arith.constant 0 : index
    %c0_0 = arith.constant 0 : index
    %0 = vector.load %arg1[%c0, %c0_0] : memref<16x2xf32, #tpu.memory_space<vmem>>, vector<16x2xf32>
    %1 = vector.extract_strided_slice %0 {offsets = [0, 0], sizes = [16, 1], strides = [1, 1]} : vector<16x2xf32> to vector<16x1xf32>
    %2 = vector.extract_strided_slice %0 {offsets = [0, 1], sizes = [16, 1], strides = [1, 1]} : vector<16x2xf32> to vector<16x1xf32>
    %c0_1 = arith.constant 0 : index
    %c0_2 = arith.constant 0 : index
    %3 = vector.load %arg2[%c0_1, %c0_2] : memref<16x128xf32, #tpu.memory_space<vmem>>, vector<16x128xf32>
    %4 = vector.broadcast %1 : vector<16x1xf32> to vector<16x128xf32>
    %5 = arith.subf %3, %4 : vector<16x128xf32>
    %6 = vector.broadcast %2 : vector<16x1xf32> to vector<16x128xf32>
    %7 = arith.mulf %5, %6 : vector<16x128xf32>
    %c0_3 = arith.constant 0 : index
    %c0_4 = arith.constant 0 : index
    %8 = vector.load %arg3[%c0_3, %c0_4] : memref<32x16xf32, #tpu.memory_space<vmem>>, vector<32x16xf32>
    %c0_5 = arith.constant 0 : index
    %c0_6 = arith.constant 0 : index
    %9 = vector.load %arg4[%c0_5, %c0_6] : memref<32x1xf32, #tpu.memory_space<vmem>>, vector<32x1xf32>
    %cst = arith.constant dense<0.000000e+00> : vector<32x128xf32>
    %10 = tpu.matmul %8, %7, %cst {dimension_numbers = #tpu.dot_dimension_numbers<[1], [0], [0], [1], [0, 0, 1, 1], [], []>} : vector<32x16xf32>, vector<16x128xf32>, vector<32x128xf32> -> vector<32x128xf32>
    %11 = vector.broadcast %9 : vector<32x1xf32> to vector<32x128xf32>
    %12 = arith.addf %10, %11 : vector<32x128xf32>
    %cst_7 = arith.constant 0.000000e+00 : f32
    %13 = vector.broadcast %cst_7 : f32 to vector<32x128xf32>
    %14 = arith.maximumf %12, %13 : vector<32x128xf32>
    %c0_8 = arith.constant 0 : index
    %c0_9 = arith.constant 0 : index
    %15 = vector.load %arg5[%c0_8, %c0_9] : memref<32x32xf32, #tpu.memory_space<vmem>>, vector<32x32xf32>
    %c0_10 = arith.constant 0 : index
    %c0_11 = arith.constant 0 : index
    %16 = vector.load %arg6[%c0_10, %c0_11] : memref<32x1xf32, #tpu.memory_space<vmem>>, vector<32x1xf32>
    %cst_12 = arith.constant dense<0.000000e+00> : vector<32x128xf32>
    %17 = tpu.matmul %15, %14, %cst_12 {dimension_numbers = #tpu.dot_dimension_numbers<[1], [0], [0], [1], [0, 0, 1, 1], [], []>} : vector<32x32xf32>, vector<32x128xf32>, vector<32x128xf32> -> vector<32x128xf32>
    %18 = vector.broadcast %16 : vector<32x1xf32> to vector<32x128xf32>
    %19 = arith.addf %17, %18 : vector<32x128xf32>
    %cst_13 = arith.constant 0.000000e+00 : f32
    %20 = vector.broadcast %cst_13 : f32 to vector<32x128xf32>
    %21 = arith.maximumf %19, %20 : vector<32x128xf32>
    %c0_14 = arith.constant 0 : index
    %c0_15 = arith.constant 0 : index
    %22 = vector.load %arg7[%c0_14, %c0_15] : memref<8x32xf32, #tpu.memory_space<vmem>>, vector<8x32xf32>
    %c0_16 = arith.constant 0 : index
    %c0_17 = arith.constant 0 : index
    %23 = vector.load %arg8[%c0_16, %c0_17] : memref<8x1xf32, #tpu.memory_space<vmem>>, vector<8x1xf32>
    %cst_18 = arith.constant dense<0.000000e+00> : vector<8x128xf32>
    %24 = tpu.matmul %22, %21, %cst_18 {dimension_numbers = #tpu.dot_dimension_numbers<[1], [0], [0], [1], [0, 0, 1, 1], [], []>} : vector<8x32xf32>, vector<32x128xf32>, vector<8x128xf32> -> vector<8x128xf32>
    %25 = vector.broadcast %23 : vector<8x1xf32> to vector<8x128xf32>
    %26 = arith.addf %24, %25 : vector<8x128xf32>
    %c0_19 = arith.constant 0 : index
    %c0_20 = arith.constant 0 : index
    %27 = vector.load %arg9[%c0_19, %c0_20] : memref<8x128xf32, #tpu.memory_space<vmem>>, vector<8x128xf32>
    tpu.vector_store %arg9[%c0_19, %c0_20], %26 {strides = array<i32>} : memref<8x128xf32, #tpu.memory_space<vmem>>, vector<8x128xf32>,
    return
  }
  func.func @transform_0(%arg0: i32) -> (i32, i32) {
    %c0_i32 = arith.constant 0 : i32
    %c0_i32_0 = arith.constant 0 : i32
    %c0_i32_1 = arith.constant 0 : i32
    return %c0_i32, %c0_i32_0 : i32, i32
  }
  func.func @transform_1(%arg0: i32) -> (i32, i32) {
    %c0_i32 = arith.constant 0 : i32
    %c0_i32_0 = arith.constant 0 : i32
    return %c0_i32, %arg0 : i32, i32
  }
  func.func @transform_2(%arg0: i32) -> (i32, i32) {
    %c0_i32 = arith.constant 0 : i32
    %c0_i32_0 = arith.constant 0 : i32
    %c0_i32_1 = arith.constant 0 : i32
    return %c0_i32, %c0_i32_0 : i32, i32
  }
  func.func @transform_3(%arg0: i32) -> (i32, i32) {
    %c0_i32 = arith.constant 0 : i32
    %c0_i32_0 = arith.constant 0 : i32
    %c0_i32_1 = arith.constant 0 : i32
    return %c0_i32, %c0_i32_0 : i32, i32
  }
  func.func @transform_4(%arg0: i32) -> (i32, i32) {
    %c0_i32 = arith.constant 0 : i32
    %c0_i32_0 = arith.constant 0 : i32
    %c0_i32_1 = arith.constant 0 : i32
    return %c0_i32, %c0_i32_0 : i32, i32
  }
  func.func @transform_5(%arg0: i32) -> (i32, i32) {
    %c0_i32 = arith.constant 0 : i32
    %c0_i32_0 = arith.constant 0 : i32
    %c0_i32_1 = arith.constant 0 : i32
    return %c0_i32, %c0_i32_0 : i32, i32
  }
  func.func @transform_6(%arg0: i32) -> (i32, i32) {
    %c0_i32 = arith.constant 0 : i32
    %c0_i32_0 = arith.constant 0 : i32
    %c0_i32_1 = arith.constant 0 : i32
    return %c0_i32, %c0_i32_0 : i32, i32
  }
  func.func @transform_7(%arg0: i32) -> (i32, i32) {
    %c0_i32 = arith.constant 0 : i32
    %c0_i32_0 = arith.constant 0 : i32
    %c0_i32_1 = arith.constant 0 : i32
    return %c0_i32, %c0_i32_0 : i32, i32
  }
  func.func @transform_8(%arg0: i32) -> (i32, i32) {
    %c0_i32 = arith.constant 0 : i32
    %c0_i32_0 = arith.constant 0 : i32
    return %c0_i32, %arg0 : i32, i32
  }
}

</mosaic_0001>

<bundles_post_ra>
// kernel: tpu_custom_call.1
= control target key start
LH: loop header
LB: loop body
LE: loop exit
PB: predicated region body
PF: predicated region fallthrough
CT: control target
= control target key end

     0   :  { %13 = vsyncpa [#allocation4], 0  ;;  %s976_s0 = inlined_call_operand.vmem [shape: f32[16,2], index: 0, kind: input, shape index: {}]   ;;  %s977_s1 = inlined_call_operand.vmem [shape: f32[16,256], index: 1, kind: input, shape index: {}]   ;;  %s978_s2 = inlined_call_operand.vmem [shape: f32[32,16], index: 2, kind: input, shape index: {}]   ;;  %s979_s3 = inlined_call_operand.vmem [shape: f32[32,1], index: 3, kind: input, shape index: {}]   ;;  %s980_s4 = inlined_call_operand.vmem [shape: f32[32,32], index: 4, kind: input, shape index: {}]   ;;  %s981_s5 = inlined_call_operand.vmem [shape: f32[32,1], index: 5, kind: input, shape index: {}]   ;;  %s982_s6 = inlined_call_operand.vmem [shape: f32[8,32], index: 6, kind: input, shape index: {}]   ;;  %s983_s7 = inlined_call_operand.vmem [shape: f32[8,1], index: 7, kind: input, shape index: {}]   ;;  %s984_s8 = inlined_call_operand.hbm [shape: f32[8,256], index: 8, kind: output, shape index: {}]  }
   0x1   :  { %15 = vsyncpa [#allocation4 + $0x1], 0  ;;  %s816_s27 = smov 0   ;;  %s818_s28 = smov 0  }
   0x2   :  { %s820_s29 = smov 0   ;;  %s822_s30 = smov 0  }
   0x3 LB: > { %s628_s9 = sadd.s32 4294967295, %s767_s30   ;;  %s629_s10 = sadd.s32 4294967294, %s767_s30   ;;  %s767_s30 = sphi %s822_s30, %s990_s30   ;;  %s763_s29 = sphi %s820_s29, %s989_s29   ;;  %s759_s28 = sphi %s818_s28, %s988_s28   ;;  %s755_s27 = sphi %s816_s27, %s987_s27  }
   0x4   : > { %s839_s11 = sadd.s32 1, %s767_s30   ;;  %s49_s12 = sadd.s32 1, %s763_s29 }
   0x5   : > { %s46_s13 = ssub.s32 %s767_s30, %s839_s11  ;;  %p56_p0 = scmp.ne.s32.totalorder %s763_s29, %s759_s28 }
   0x6   : > { %p47_p1 = scmp.eq.s32.totalorder %s46_s13, 0  ;;  %p57_p2 = scmp.eq.s32.totalorder %s767_s30, 0 }
   0x7   : > { %p212_p3 = scmp.eq.s32.totalorder %s628_s9, 1  ;;  %p217_p4 = scmp.ne.s32.totalorder %s759_s28, %s755_s27 }
   0x8   : > { %s852_s14 = scalar_select %p47_p1, %s763_s29, %s49_s12  }
   0x9   : > { %p58_p5 = por %p57_p2, %p56_p0  ;;  %p854_p6 = por %p212_p3, %p56_p0 }
   0xa   : > { %p218_p7 = scmp.eq.s32.totalorder %s629_s10, 1  ;;  %p631_p9 = scmp.ge.s32.totalorder %s767_s30, 2 }
   0xc   : > { %p858_p8 = por %p218_p7, %p217_p4  ;;  %255 = sbr.rel (%p631_p9) target bundleno = 23 (0x17), region = 44 }
  0x11   : > { %258 = sbr.rel (!%p58_p5) target bundleno = 23 (0x17), region = 48  ;;  %s260_s17 = sand.u32 (%p58_p5), 1, %s763_s29  }
  0x12   : > { %s633_s18 = sshll.u32 (%p58_p5), %s767_s30, 3  ;;  %s632_s19 = sshll.u32 (%p58_p5), %s260_s17, 4 }
  0x13   : > { %s264_s22 = scalar_lea.vmem (%p58_p5), %s977_s1, %s633_s18  ;;  %s262_s23 = scalar_lea.vmem (%p58_p5), [#allocation2], %s632_s19 }
  0x14   : > { %v295_v0 = vld [vmem:[%s264_s22] sm:$0xff] (%p58_p5)  ;;  %v297_v1 = vld [vmem:[%s264_s22 + $0x10] sm:$0xff] (%p58_p5) }
  0x15   : > { %296 = vst [vmem:[%s262_s23] sm:$0xff] (%p58_p5), %v295_v0 }
  0x16   : > { %298 = vst [vmem:[%s262_s23 + $0x8] sm:$0xff] %v297_v1 }
  0x17 PF: > { %p634_p10 = scmp.ge.s32.totalorder %s767_s30, 1  ;;  %p303_p11 = scmp.lt.s32.totalorder %s767_s30, 3 }
  0x19   : > { %p304_p12 = pnand %p634_p10, %p303_p11 }
  0x1a   : > { %s888_s21 = sand.u32 (!%p304_p12), 1, %s759_s28   ;;  %s647_s18 = sshll.u32 (!%p304_p12), %s628_s9, 3 }
  0x1b   : > { %307 = sbr.rel (%p304_p12) target bundleno = 602 (0x25a), region = 86  ;;  %s635_s22 = sshll.u32 (!%p304_p12), %s888_s21, 4 }
  0x1c   : > { %s312_s25 = scalar_lea.vmem (!%p304_p12), [#allocation2], %s635_s22  ;;  %s636_s17 = sshll.u32 (!%p304_p12), %s888_s21, 3 }
  0x1d   : > { %s559_s22 = scalar_lea.hbm (!%p304_p12), %s984_s8, %s647_s18  ;;  %s342_s23 = scalar_lea.vmem (!%p304_p12), [#allocation3], %s636_s17 }
  0x1e   : > { %s561_s24 = sshll.u32 (!%p304_p12), %s342_s23, 4  ;;  %s549_s26 = scalar_lea.sflag (!%p304_p12), [#allocation4], %s888_s21  ;;  %s562_s24 = int_to_ptr.vmem [resolvable:$true] %s561_s24 }
  0x1f   : > { %s725_s17 = scalar_lea.hbm (!%p304_p12), %s984_s8, 16 }
  0x20   : > { %v344_v2 = vld [vmem:[%s976_s0 + $0x8] sm:$0xff]  ;;  %v769_v3 = vmov 1   ;;  %v770_v4 = vmov 0   ;;  %v343_v5 = vld [vmem:[%s976_s0] sm:$0xff]  ;;  %v449_v7 = vld [vmem:[%s981_s5 + $0x10] sm:$0xff]  ;;  %vm397_vm0 = vcmask 130048  }
  0x21   : > { %702 = vset.pattern.permute.xlu1 %v769_v3  ;;  %701 = vset.pattern.permute.xlu0 %v770_v4  ;;  %v374_v6 = vld [vmem:[%s979_s3 + $0x8] sm:$0xff]  ;;  %v518_v8 = vld [vmem:[%s983_s7] sm:$0xff]  ;;  %v376_v13 = vld [vmem:[%s979_s3 + $0x18] sm:$0xff]  ;;  %vm471_vm1 = vcmask 261120  }
  0x22   : > { %364 = vperm.xlu1 %702, %v344_v2   ;;  %354 = vperm.xlu0 %701, %v344_v2   ;;  %v373_v9 = vld [vmem:[%s979_s3] sm:$0xff]  ;;  %v346_v10 = vld [vmem:[%s312_s25 + $0x8] sm:$0xff]  ;;  %v375_v18 = vld [vmem:[%s979_s3 + $0x10] sm:$0xff] }
  0x23   : > { %703 = vset.pattern.permute.xlu2 %v770_v4  ;;  %v448_v14 = vld [vmem:[%s981_s5 + $0x8] sm:$0xff]  ;;  %v345_v17 = vld [vmem:[%s312_s25] sm:$0xff]  ;;  %v372_v24 = vld [vmem:[%s978_s2 + $0x18] sm:$0xff]  ;;  %s563_s25 = sshll.u32 %s559_s22, 4  ;;  %s564_s25 = int_to_ptr.hbm [resolvable:$true] %s563_s25 }
  0x24   : > { %394 = vperm.xlu2 %703, %v376_v13   ;;  %v369_v23 = vld [vmem:[%s978_s2] sm:$0xff]  ;;  %v450_v25 = vld [vmem:[%s981_s5 + $0x18] sm:$0xff]  ;;  %v370_v26 = vld [vmem:[%s978_s2 + $0x8] sm:$0xff]  ;;  %s719_s10 = sshra.s32 %s564_s25, 4  ;;  %s720_s10 = int_to_ptr.hbm [resolvable:$true] %s719_s10 }
  0x25   : > { %v447_v27 = vld [vmem:[%s981_s5] sm:$0xff]  ;;  %v371_v28 = vld [vmem:[%s978_s2 + $0x10] sm:$0xff]  ;;  %v444_v46 = vld [vmem:[%s980_s4 + $0x8] sm:$0xff]  ;;  %s721_s12 = scalar_lea.hbm %s720_s10, 8  ;;  %p726_p2 = scmp.lt.s32.totalorder %s720_s10, %s984_s8 }
  0x26   : > { %v443_v45 = vld [vmem:[%s980_s4] sm:$0xff]  ;;  %v445_v47 = vld [vmem:[%s980_s4 + $0x10] sm:$0xff]  ;;  %v446_v48 = vld [vmem:[%s980_s4 + $0x18] sm:$0xff]  ;;  %p722_p13 = scmp.ne.s32.totalorder %s720_s10, %s721_s12  ;;  %p727_p3 = scmp.lt.s32.totalorder %s725_s17, %s721_s12 }
  0x27   : > { %v517_v1 = vld [vmem:[%s982_s6] sm:$0xff] }
  0x28   : > { %p723_p0 = pnand %p722_p13, %p854_p6  ;;  %p728_p4 = por %p727_p3, %p726_p2 }
  0x2a   : > { %360 = vperm.xlu1 %702, %v343_v5   ;;  %349 = vperm.xlu0 %701, %v343_v5   ;;  %p724_p1 = pneg %p723_p0 }
  0x2c   : > { %389 = vperm.xlu2 %703, %v375_v18   ;;  %p729_p5 = pnand %p728_p4, %p724_p1 }
  0x32   : > { %384 = vperm.xlu0 %701, %v374_v6   ;;  %704 = vset.pattern.permute.xlu1 %v770_v4 }
  0x33   : > { %379 = vperm.xlu1 %704, %v373_v9  }
  0x34   : > { %468 = vperm.xlu2 %703, %v450_v25  }
  0x3a   : > { %463 = vperm.xlu0 %701, %v449_v7  }
  0x3b   : > { %458 = vperm.xlu1 %704, %v448_v14  }
  0x3c   : > { %453 = vperm.xlu2 %703, %v447_v27  }
  0x42   : > { %521 = vperm.xlu0 %701, %v518_v8  }
  0x7e   : > { %v395_v29 = vpop.permute.xlu2 %394 }
  0x86   : > { %v390_v36 = vpop.permute.xlu2 %389 }
  0x8e   : > { %v469_v50 = vpop.permute.xlu2 %468 }
  0x94   : > { %v365_v11 = vpop.permute.xlu1 %364  ;;  %v355_v12 = vpop.permute.xlu0 %354 }
  0x95   : > { %v358_v15 = vsub.f32 %v346_v10, %v355_v12 }
  0x96   : > { %v454_v60 = vpop.permute.xlu2 %453 }
  0x97   : > { %v368_v16 = vmul.f32 %v365_v11, %v358_v15 }
  0x99   : > { %424 = vmatpush.msra.mxu0 %v368_v16  ;;  %650 = vmatpush.msra.mxu1 %v368_v16 }
  0x9c   : > { %v350_v19 = vpop.permute.xlu0 %349  ;;  %v361_v21 = vpop.permute.xlu1 %360 }
  0x9d   : > { %v357_v20 = vsub.f32 %v345_v17, %v350_v19 }
  0x9f   : > { %v367_v22 = vmul.f32 %v361_v21, %v357_v20 }
  0xa1   : > { %425 = vmatpush.msra.mxu0 %v367_v22  ;;  %651 = vmatpush.msra.mxu1 %v367_v22 }
  0xa2   : > { %637 = vmatmul.msk.f32.vlgmr.msra.gmra.mxu0 %vm397_vm0, %v369_v23  ;;  %640 = vmatmul.msk.f32.vlgmr.msra.gmra.mxu1 %vm397_vm0, %v372_v24 }
  0xa4   : > { %v385_v35 = vpop.permute.xlu0 %384 }
  0xa5   : > { %v380_v37 = vpop.permute.xlu1 %379 }
  0xaa   : > { %638 = vmatmul.msk.f32.gmra.mxu0 %vm397_vm0, %v370_v26 }
  0xac   : > { %v464_v51 = vpop.permute.xlu0 %463 }
  0xad   : > { %v459_v56 = vpop.permute.xlu1 %458 }
  0xb2   : > { %639 = vmatmul.msk.f32.gmra.mxu0 %vm397_vm0, %v371_v28 }
  0xb4   : > { %v522_v2 = vpop.permute.xlu0 %521 }
 0x11f   : > { %v427_v30 = vpop.f32.mrf.mxu0  ;;  %v436_v31 = vpop.f32.mrf.mxu1 }
 0x120   : > { %v437_v32 = vadd.f32 %v436_v31, %v395_v29  ;;  %v428_v41 = vadd.f32 %v427_v30, %v380_v37 }
 0x122   : > { %v442_v33 = vmax.f32 %v437_v32, 0.0  ;;  %v439_v44 = vmax.f32 %v428_v41, 0.0 }
 0x124   : > { %496 = vmatpush.msrb.mxu1 %v442_v33  ;;  %652 = vmatpush.msra.mxu2 %v442_v33 }
 0x125   : > { %653 = vmatpush.msra.mxu3 %v442_v33 }
 0x127   : > { %v430_v34 = vpop.f32.mrf.mxu0 }
 0x128   : > { %v431_v39 = vadd.f32 %v430_v34, %v385_v35 }
 0x12a   : > { %v440_v43 = vmax.f32 %v431_v39, 0.0 }
 0x12f   : > { %v433_v38 = vpop.f32.mrf.mxu0 }
 0x130   : > { %v434_v40 = vadd.f32 %v433_v38, %v390_v36 }
 0x132   : > { %v441_v42 = vmax.f32 %v434_v40, 0.0 }
 0x134   : > { %497 = vmatpush.msrb.mxu1 %v441_v42  ;;  %654 = vmatpush.msra.mxu2 %v441_v42 }
 0x135   : > { %655 = vmatpush.msra.mxu3 %v441_v42 }
 0x136   : > { %498 = vmatpush.msrb.mxu1 %v440_v43  ;;  %656 = vmatpush.msra.mxu2 %v440_v43 }
 0x137   : > { %657 = vmatpush.msra.mxu3 %v440_v43 }
 0x138   : > { %499 = vmatpush.msrb.mxu1 %v439_v44  ;;  %658 = vmatpush.msra.mxu2 %v439_v44 }
 0x139   : > { %659 = vmatpush.msra.mxu3 %v439_v44  ;;  %641 = vmatmul.msk.f32.vlgmr.msrb.gmra.mxu1 %vm471_vm1, %v443_v45 }
 0x13a   : > { %642 = vmatmul.msk.f32.vlgmr.msra.gmra.mxu2 %vm471_vm1, %v444_v46  ;;  %643 = vmatmul.msk.f32.vlgmr.msra.gmra.mxu3 %vm471_vm1, %v445_v47 }
 0x142   : > { %644 = vmatmul.msk.f32.gmra.mxu3 %vm471_vm1, %v446_v48 }
 0x1b6   : > { %v501_v57 = vpop.f32.mrf.mxu1 }
 0x1b7   : > { %v502_v61 = vadd.f32 %v501_v57, %v454_v60 }
 0x1b9   : > { %v513_v0 = vmax.f32 %v502_v61, 0.0 }
 0x1bd   : > { %v507_v49 = vpop.f32.mrf.mxu3  ;;  %v504_v52 = vpop.f32.mrf.mxu2 }
 0x1be   : > { %v508_v54 = vadd.f32 %v507_v49, %v464_v51  ;;  %v505_v58 = vadd.f32 %v504_v52, %v459_v56 }
 0x1c0   : > { %v515_v62 = vmax.f32 %v508_v54, 0.0  ;;  %v514_v63 = vmax.f32 %v505_v58, 0.0 }
 0x1c5   : > { %v510_v53 = vpop.f32.mrf.mxu3 }
 0x1c6   : > { %v511_v55 = vadd.f32 %v510_v53, %v469_v50 }
 0x1c8   : > { %v516_v59 = vmax.f32 %v511_v55, 0.0 }
 0x1ca   : > { %539 = vmatpush.msrb.mxu2 %v516_v59 }
 0x1cc   : > { %540 = vmatpush.msrb.mxu2 %v515_v62 }
 0x1ce   : > { %541 = vmatpush.msrb.mxu2 %v514_v63 }
 0x1d0   : > { %542 = vmatpush.msrb.mxu2 %v513_v0 }
 0x1d1   : > { %645 = vmatmul.msk.f32.vlgmr.msrb.gmra.mxu2 %vm471_vm1, %v517_v1 }
 0x254   : > { %v544_v3 = vpop.f32.mrf.mxu2 }
 0x255   : > { %v545_v4 = vadd.f32 %v544_v3, %v522_v2 }
 0x257   : > { %547 = vst [vmem:[%s342_s23] sm:$0xff] %v545_v4 }
 0x258   : > { %732 = shalt.err (!%p729_p5)
}
 0x259   : > { %660 = dma.vmem_to_hbm [thread:$0]  (%p854_p6), %s562_s24, 128, %s564_s25, %s549_s26  }
 0x25a PF: > { %s575_s21 = sand.u32 1, %s755_s27   ;;  %p663_p7 = pnand %p631_p9, %p858_p8 }
 0x25b   : > { %s576_s20 = scalar_lea.sflag [#allocation4], %s575_s21 }
 0x25c   : > { %p664_p10 = pneg %p663_p7 }
 0x25e   : > { %750 = dma.done.wait (%p664_p10), %s576_s20, 128  }
 0x25f   : > { %752 = vsyncadd (%p664_p10), %s576_s20, 4294967168  ;;  %p18_p11 = scmp.ge.s32.totalorder %s839_s11, 4   ;;  %s987_s27 = smov %s759_s28 }
 0x260   : > { %s988_s28 = smov %s763_s29  ;;  %s989_s29 = smov %s852_s14 }
 0x261   : > { %s990_s30 = smov %s839_s11  ;;  %20 = sbr.rel (!%p18_p11) target bundleno = 3 (0x3), region = 130 }
 0x266   :  { %582 = vsyncpa [#allocation4], 1 }
 0x267   :  { %584 = vsyncpa [#allocation4 + $0x1], 1 }

</bundles_post_ra>
